<compile_context>
chip_gen: v6e
topology: v6e:2x2x1
jax: 0.10.0
libtpu: 0.0.40
codegen_flags: <defaults>
</compile_context>

<pallas_src>
import functools
import math

import jax
import jax.numpy as jnp
from jax.experimental import pallas as pl
from jax.experimental.pallas import tpu as pltpu


def _round_up(x: int, m: int) -> int:
    return (x + m - 1) // m * m


def _round_down(x: int, m: int) -> int:
    return x // m * m


def _vmem_capacity_bytes() -> int:
    """Physical per-core VMEM (128 MiB v5e/v6e, 64 MiB v7x); conservative fallback."""
    try:
        return int(pltpu.get_tpu_info().vmem_capacity_bytes)
    except Exception:
        return 64 << 20  # assume the smallest (v7x per-TC) if the query fails


def _rmlm_kernel(f_ref, g_ref, rf_ref, rg_ref, o_ref, *, scale):
    w_dtype = rf_ref.dtype
    f = f_ref[...]
    g = g_ref[...]
    # Cast the tiny activation tiles down to the weight dtype (bf16 path) so
    # the MXU uses its native low-precision path and the large Rf/Rg tiles are
    # never upcast to f32 in VMEM.  Accumulation stays f32.
    if f.dtype != w_dtype:
        f = f.astype(w_dtype)
    if g.dtype != w_dtype:
        g = g.astype(w_dtype)
    fr = jnp.dot(f, rf_ref[...], preferred_element_type=jnp.float32)
    gr = jnp.dot(g, rg_ref[...], preferred_element_type=jnp.float32)
    out = fr * gr
    if scale is not None:  # only when the caller did NOT fold the scale into Rf
        out = out * scale
    o_ref[...] = out.astype(o_ref.dtype)


def _choose_tile_b(b_pad, features_dim, num_classes, act_itemsize,
                   per_buffer_budget=2 << 20):
    """Batch tile keeping the resident f/g block around <= 2 MiB per buffer."""
    bytes_per_row = max((features_dim + num_classes) * act_itemsize, 1)
    rows = max(8, _round_down(per_buffer_budget // bytes_per_row, 8))
    return min(b_pad, rows)


def _choose_tile_n(output_dim, features_dim, num_classes, tile_b,
                   w_itemsize, act_itemsize, out_itemsize, vmem_budget_bytes):
    """Lane-dense output tile targeting 512-1024 columns and >= 2 grid steps."""
    if output_dim <= 128:
        return int(output_dim)  # full-dim block; always layout-legal
    # Bytes per output column (double-buffered Rf/Rg column slices + out tile).
    per_col = 2 * (features_dim + num_classes) * w_itemsize + 2 * tile_b * out_itemsize
    resident = 2 * tile_b * (features_dim + num_classes) * act_itemsize
    avail = max(vmem_budget_bytes - resident, per_col * 128)
    fit = max(128, _round_down(avail // per_col, 128))
    # 512-1024 columns already saturates HBM streaming; more only hurts overlap.
    tile = min(fit, 1024)
    # Force >= 2 grid steps along output_dim so v7x's two TensorCores both
    # stream Rf (no-op on 1-TC v5e/v6e; no-op when output_dim < 256).
    half = _round_down(output_dim // 2, 128)
    if half >= 128:
        tile = min(tile, half)
    return int(max(128, min(tile, output_dim)))


def randomized_multi_linear_map(f, g, Rf, Rg, *, scale=None, tile_n=None,
                                tile_b=None, vmem_budget_bytes=None):
    """out = (f @ Rf) * (g @ Rg) [* scale]

    Fast path: Rf/Rg produced by init_randomized_multi_linear_map (bf16, with
    1/sqrt(output_dim) folded into Rf) and scale=None.  Pass f32 matrices and
    scale=1/sqrt(output_dim) to reproduce the PyTorch module bit-for-bit-ish.
    """
    B, features_dim = f.shape
    Bg, num_classes = g.shape
    assert Bg == B
    output_dim = Rf.shape[1]
    assert Rf.shape == (features_dim, output_dim)
    assert Rg.shape == (num_classes, output_dim)

    out_dtype = f.dtype
    act_itemsize = jnp.dtype(f.dtype).itemsize
    w_itemsize = jnp.dtype(Rf.dtype).itemsize
    out_itemsize = jnp.dtype(out_dtype).itemsize

    # --- batch padding to the f32 sublane (8): full-vreg, unmasked stores ---
    b_pad = max(8, _round_up(B, 8))
    if b_pad != B:
        f = jnp.pad(f, ((0, b_pad - B), (0, 0)))
        g = jnp.pad(g, ((0, b_pad - B), (0, 0)))

    # --- generation-aware VMEM budget/limit ---
    capacity = _vmem_capacity_bytes()
    if vmem_budget_bytes is None:
        vmem_budget_bytes = min(24 << 20, (capacity * 3) // 8)

    if tile_b is None:
        tile_b = _choose_tile_b(b_pad, features_dim, num_classes, act_itemsize)
    tile_b = max(8, min(_round_up(int(tile_b), 8), b_pad))

    if tile_n is None:
        tile_n = _choose_tile_n(output_dim, features_dim, num_classes, tile_b,
                                w_itemsize, act_itemsize, out_itemsize,
                                vmem_budget_bytes)
    tile_n = min(int(tile_n), output_dim)
    if tile_n < output_dim:
        tile_n = max(128, _round_down(tile_n, 128))  # lane-dense partial tiles

    n_b_tiles = pl.cdiv(b_pad, tile_b)
    n_n_tiles = pl.cdiv(output_dim, tile_n)
    grid = (n_b_tiles, n_n_tiles)

    # f/g never change along the output_dim axis; with a single batch tile they
    # are fully grid-invariant, so one VMEM buffer (no double buffering) suffices.
    want_single_buffer_fg = (n_b_tiles == 1)

    def vmem_estimate(fg_buffers):
        return (fg_buffers * tile_b * (features_dim + num_classes) * act_itemsize
                + 2 * (features_dim + num_classes) * tile_n * w_itemsize
                + 2 * tile_b * tile_n * out_itemsize)

    kernel = functools.partial(_rmlm_kernel, scale=scale)

    def run(fg_buffers):
        fg_mode = pl.Buffered(1) if fg_buffers == 1 else None
        vmem_est = vmem_estimate(fg_buffers)
        vmem_limit = int(min(max(16 << 20, int(1.2 * vmem_est)),
                             min(48 << 20, (capacity * 3) // 4)))
        return pl.pallas_call(
            kernel,
            out_shape=jax.ShapeDtypeStruct((b_pad, output_dim), out_dtype),
            grid_spec=pltpu.PrefetchScalarGridSpec(
                num_scalar_prefetch=0,
                grid=grid,
                in_specs=[
                    # f and g: tiled over batch only, grid-invariant along output_dim.
                    pl.BlockSpec((tile_b, features_dim), lambda i, j: (i, 0),
                                 pipeline_mode=fg_mode),
                    pl.BlockSpec((tile_b, num_classes), lambda i, j: (i, 0),
                                 pipeline_mode=fg_mode),
                    # Random projections: tiled along output_dim only.
                    pl.BlockSpec((features_dim, tile_n), lambda i, j: (0, j)),
                    pl.BlockSpec((num_classes, tile_n), lambda i, j: (0, j)),
                ],
                out_specs=pl.BlockSpec((tile_b, tile_n), lambda i, j: (i, j)),
            ),
            compiler_params=pltpu.CompilerParams(
                dimension_semantics=("parallel", "parallel"),
                vmem_limit_bytes=vmem_limit,
            ),
        )(f, g, Rf, Rg)

    if want_single_buffer_fg:
        # Buffered(1) is a pure VMEM saving; fall back to default buffering if
        # this Pallas/Mosaic version rejects single-buffered pipeline blocks.
        try:
            out = jax.block_until_ready(run(1))
        except Exception:
            out = run(2)
    else:
        out = run(2)

    return out[:B, :]


def init_randomized_multi_linear_map(key, features_dim, num_classes, output_dim,
                                     weight_dtype=jnp.bfloat16):
    """Sample the fixed random projections once (torch.randn equivalent), fold
    the 1/sqrt(output_dim) scale into Rf, and cast the kernel copies to
    `weight_dtype` (bf16 by default) ONCE here -- never per call.

    Returns (Rf_f32, Rg_f32, Rf_kernel, Rg_kernel)."""
    krf, krg = jax.random.split(key)
    Rf = jax.random.normal(krf, (features_dim, output_dim), dtype=jnp.float32)
    Rg = jax.random.normal(krg, (num_classes, output_dim), dtype=jnp.float32)
    inv_sqrt_d = 1.0 / math.sqrt(float(output_dim))
    Rf_kernel = (Rf * inv_sqrt_d).astype(weight_dtype)
    Rg_kernel = Rg.astype(weight_dtype)
    return Rf, Rg, Rf_kernel, Rg_kernel


if __name__ == "__main__":
    # Small shapes consistent with the module's forward (the real module uses
    # features_dim=3072, num_classes=64, output_dim=3072; scaled down here).
    batch = 2
    features_dim = 256
    num_classes = 64
    output_dim = 1024

    key = jax.random.PRNGKey(0)
    kf, kg, kw = jax.random.split(key, 3)

    f = jax.random.normal(kf, (batch, features_dim), dtype=jnp.float32)
    g = jax.random.normal(kg, (batch, num_classes), dtype=jnp.float32)
    Rf32, Rg32, Rf_k, Rg_k = init_randomized_multi_linear_map(
        kw, features_dim, num_classes, output_dim)

    # Pure-JAX f32 reference (matches the PyTorch module exactly).
    ref = (f @ Rf32) * (g @ Rg32) / math.sqrt(float(output_dim))

    # Fast path: bf16 weights cast at init, scale folded into Rf, no in-kernel
    # multiply.  bf16 weights give ~1e-2 relative error vs the f32 reference,
    # so this path is checked against a relative-L2 tolerance.
    out = randomized_multi_linear_map(f, g, Rf_k, Rg_k)
    out = jax.block_until_ready(out)
    assert out.shape == (batch, output_dim)
    rel = jnp.linalg.norm(out.astype(jnp.float32) - ref) / jnp.linalg.norm(ref)
    assert float(rel) < 2e-2, float(rel)

    # Full-precision path (f32 weights, in-kernel scale): tight tolerance.
    out2 = randomized_multi_linear_map(
        f, g, Rf32, Rg32, scale=1.0 / math.sqrt(float(output_dim)))
    out2 = jax.block_until_ready(out2)
    assert jnp.allclose(out2, ref, atol=2e-4, rtol=2e-4)

    # TODO(synk): the rest of Baseline_Counter (backbone, MoE heads, Gaussian
    # label smoothing, losses, domain classifier) is an orchestration graph,
    # not a single kernel; only the RandomizedMultiLinearMap forward is here.
    print("KERNEL_OK")
</pallas_src>

<mosaic_0001>
module attributes {stable_mosaic.version = 11 : i64} {
  func.func @_rmlm_kernel(%arg0: i32, %arg1: i32, %arg2: memref<8x256xf32, #tpu.memory_space<vmem>>, %arg3: memref<8x64xf32, #tpu.memory_space<vmem>>, %arg4: memref<256x512xbf16, #tpu.memory_space<vmem>>, %arg5: memref<64x512xbf16, #tpu.memory_space<vmem>>, %arg6: memref<8x512xf32, #tpu.memory_space<vmem>>) attributes {dimension_semantics = [#tpu.dimension_semantics<parallel>, #tpu.dimension_semantics<parallel>], iteration_bounds = array<i64: 1, 2>, scalar_prefetch = 0 : i64, scratch_operands = 0 : i64, tpu.core_type = #tpu.core_type<tc>, window_params = [{pipeline_mode = #tpu.pipeline_mode<synchronous>, transform_indices = @transform_0, window_bounds = array<i64: 8, 256>}, {pipeline_mode = #tpu.pipeline_mode<synchronous>, transform_indices = @transform_1, window_bounds = array<i64: 8, 64>}, {transform_indices = @transform_2, window_bounds = array<i64: 256, 512>}, {transform_indices = @transform_3, window_bounds = array<i64: 64, 512>}, {transform_indices = @transform_4, window_bounds = array<i64: 8, 512>}]} {
    %c0 = arith.constant 0 : index
    %c0_0 = arith.constant 0 : index
    %0 = vector.load %arg2[%c0, %c0_0] : memref<8x256xf32, #tpu.memory_space<vmem>>, vector<8x256xf32>
    %c0_1 = arith.constant 0 : index
    %c0_2 = arith.constant 0 : index
    %1 = vector.load %arg3[%c0_1, %c0_2] : memref<8x64xf32, #tpu.memory_space<vmem>>, vector<8x64xf32>
    %2 = arith.truncf %0 : vector<8x256xf32> to vector<8x256xbf16>
    %3 = arith.truncf %1 : vector<8x64xf32> to vector<8x64xbf16>
    %c0_3 = arith.constant 0 : index
    %c0_4 = arith.constant 0 : index
    %4 = vector.load %arg4[%c0_3, %c0_4] : memref<256x512xbf16, #tpu.memory_space<vmem>>, vector<256x512xbf16>
    %cst = arith.constant dense<0.000000e+00> : vector<8x512xf32>
    %5 = tpu.matmul %2, %4, %cst {dimension_numbers = #tpu.dot_dimension_numbers<[1], [0], [0], [1], [0, 0, 1, 1], [], []>} : vector<8x256xbf16>, vector<256x512xbf16>, vector<8x512xf32> -> vector<8x512xf32>
    %c0_5 = arith.constant 0 : index
    %c0_6 = arith.constant 0 : index
    %6 = vector.load %arg5[%c0_5, %c0_6] : memref<64x512xbf16, #tpu.memory_space<vmem>>, vector<64x512xbf16>
    %cst_7 = arith.constant dense<0.000000e+00> : vector<8x512xf32>
    %7 = tpu.matmul %3, %6, %cst_7 {dimension_numbers = #tpu.dot_dimension_numbers<[1], [0], [0], [1], [0, 0, 1, 1], [], []>} : vector<8x64xbf16>, vector<64x512xbf16>, vector<8x512xf32> -> vector<8x512xf32>
    %8 = arith.mulf %5, %7 : vector<8x512xf32>
    %c0_8 = arith.constant 0 : index
    %c0_9 = arith.constant 0 : index
    %9 = vector.load %arg6[%c0_8, %c0_9] : memref<8x512xf32, #tpu.memory_space<vmem>>, vector<8x512xf32>
    tpu.vector_store %arg6[%c0_8, %c0_9], %8 {strides = array<i32>} : memref<8x512xf32, #tpu.memory_space<vmem>>, vector<8x512xf32>,
    return
  }
  func.func @transform_0(%arg0: i32, %arg1: i32) -> (i32, i32) {
    %c0_i32 = arith.constant 0 : i32
    %c0_i32_0 = arith.constant 0 : i32
    return %arg0, %c0_i32 : i32, i32
  }
  func.func @transform_1(%arg0: i32, %arg1: i32) -> (i32, i32) {
    %c0_i32 = arith.constant 0 : i32
    %c0_i32_0 = arith.constant 0 : i32
    return %arg0, %c0_i32 : i32, i32
  }
  func.func @transform_2(%arg0: i32, %arg1: i32) -> (i32, i32) {
    %c0_i32 = arith.constant 0 : i32
    %c0_i32_0 = arith.constant 0 : i32
    return %c0_i32, %arg1 : i32, i32
  }
  func.func @transform_3(%arg0: i32, %arg1: i32) -> (i32, i32) {
    %c0_i32 = arith.constant 0 : i32
    %c0_i32_0 = arith.constant 0 : i32
    return %c0_i32, %arg1 : i32, i32
  }
  func.func @transform_4(%arg0: i32, %arg1: i32) -> (i32, i32) {
    %c0_i32 = arith.constant 0 : i32
    return %arg0, %arg1 : i32, i32
  }
}

module attributes {stable_mosaic.version = 11 : i64} {
  func.func @_rmlm_kernel(%arg0: i32, %arg1: i32, %arg2: memref<8x256xf32, #tpu.memory_space<vmem>>, %arg3: memref<8x64xf32, #tpu.memory_space<vmem>>, %arg4: memref<256x512xbf16, #tpu.memory_space<vmem>>, %arg5: memref<64x512xbf16, #tpu.memory_space<vmem>>, %arg6: memref<8x512xf32, #tpu.memory_space<vmem>>) attributes {dimension_semantics = [#tpu.dimension_semantics<parallel>, #tpu.dimension_semantics<parallel>], iteration_bounds = array<i64: 1, 2>, scalar_prefetch = 0 : i64, scratch_operands = 0 : i64, tpu.core_type = #tpu.core_type<tc>, window_params = [{transform_indices = @transform_0, window_bounds = array<i64: 8, 256>}, {transform_indices = @transform_1, window_bounds = array<i64: 8, 64>}, {transform_indices = @transform_2, window_bounds = array<i64: 256, 512>}, {transform_indices = @transform_3, window_bounds = array<i64: 64, 512>}, {transform_indices = @transform_4, window_bounds = array<i64: 8, 512>}]} {
    %c0 = arith.constant 0 : index
    %c0_0 = arith.constant 0 : index
    %0 = vector.load %arg2[%c0, %c0_0] : memref<8x256xf32, #tpu.memory_space<vmem>>, vector<8x256xf32>
    %c0_1 = arith.constant 0 : index
    %c0_2 = arith.constant 0 : index
    %1 = vector.load %arg3[%c0_1, %c0_2] : memref<8x64xf32, #tpu.memory_space<vmem>>, vector<8x64xf32>
    %2 = arith.truncf %0 : vector<8x256xf32> to vector<8x256xbf16>
    %3 = arith.truncf %1 : vector<8x64xf32> to vector<8x64xbf16>
    %c0_3 = arith.constant 0 : index
    %c0_4 = arith.constant 0 : index
    %4 = vector.load %arg4[%c0_3, %c0_4] : memref<256x512xbf16, #tpu.memory_space<vmem>>, vector<256x512xbf16>
    %cst = arith.constant dense<0.000000e+00> : vector<8x512xf32>
    %5 = tpu.matmul %2, %4, %cst {dimension_numbers = #tpu.dot_dimension_numbers<[1], [0], [0], [1], [0, 0, 1, 1], [], []>} : vector<8x256xbf16>, vector<256x512xbf16>, vector<8x512xf32> -> vector<8x512xf32>
    %c0_5 = arith.constant 0 : index
    %c0_6 = arith.constant 0 : index
    %6 = vector.load %arg5[%c0_5, %c0_6] : memref<64x512xbf16, #tpu.memory_space<vmem>>, vector<64x512xbf16>
    %cst_7 = arith.constant dense<0.000000e+00> : vector<8x512xf32>
    %7 = tpu.matmul %3, %6, %cst_7 {dimension_numbers = #tpu.dot_dimension_numbers<[1], [0], [0], [1], [0, 0, 1, 1], [], []>} : vector<8x64xbf16>, vector<64x512xbf16>, vector<8x512xf32> -> vector<8x512xf32>
    %8 = arith.mulf %5, %7 : vector<8x512xf32>
    %c0_8 = arith.constant 0 : index
    %c0_9 = arith.constant 0 : index
    %9 = vector.load %arg6[%c0_8, %c0_9] : memref<8x512xf32, #tpu.memory_space<vmem>>, vector<8x512xf32>
    tpu.vector_store %arg6[%c0_8, %c0_9], %8 {strides = array<i32>} : memref<8x512xf32, #tpu.memory_space<vmem>>, vector<8x512xf32>,
    return
  }
  func.func @transform_0(%arg0: i32, %arg1: i32) -> (i32, i32) {
    %c0_i32 = arith.constant 0 : i32
    %c0_i32_0 = arith.constant 0 : i32
    return %arg0, %c0_i32 : i32, i32
  }
  func.func @transform_1(%arg0: i32, %arg1: i32) -> (i32, i32) {
    %c0_i32 = arith.constant 0 : i32
    %c0_i32_0 = arith.constant 0 : i32
    return %arg0, %c0_i32 : i32, i32
  }
  func.func @transform_2(%arg0: i32, %arg1: i32) -> (i32, i32) {
    %c0_i32 = arith.constant 0 : i32
    %c0_i32_0 = arith.constant 0 : i32
    return %c0_i32, %arg1 : i32, i32
  }
  func.func @transform_3(%arg0: i32, %arg1: i32) -> (i32, i32) {
    %c0_i32 = arith.constant 0 : i32
    %c0_i32_0 = arith.constant 0 : i32
    return %c0_i32, %arg1 : i32, i32
  }
  func.func @transform_4(%arg0: i32, %arg1: i32) -> (i32, i32) {
    %c0_i32 = arith.constant 0 : i32
    return %arg0, %arg1 : i32, i32
  }
}

</mosaic_0001>

<bundles_post_ra>
// kernel: tpu_custom_call.1
= control target key start
LH: loop header
LB: loop body
LE: loop exit
PB: predicated region body
PF: predicated region fallthrough
CT: control target
= control target key end

     0   :  { %s1970_s0 = inlined_call_operand.hbm [shape: f32[8,256], index: 0, kind: input, shape index: {}]   ;;  %s1971_s1 = inlined_call_operand.hbm [shape: f32[8,64], index: 1, kind: input, shape index: {}]   ;;  %s1972_s2 = inlined_call_operand.hbm [shape: bf16[256,1024], index: 2, kind: input, shape index: {}]   ;;  %s1973_s3 = inlined_call_operand.hbm [shape: bf16[64,1024], index: 3, kind: input, shape index: {}]   ;;  %s1974_s4 = inlined_call_operand.hbm [shape: f32[8,1024], index: 4, kind: output, shape index: {}]  }
   0x1   :  { %1980 = sst [smem:[#allocation15_spill]] %s1970_s0 }
   0x2   :  { %9 = vsyncpa [#allocation3], 0 }
   0x3   :  { %10 = vsyncpa [#allocation6], 0 }
   0x4   :  { %11 = vsyncpa [#allocation4], 0 }
   0x5   :  { %13 = vsyncpa [#allocation4 + $0x1], 0  ;;  %s1664_s15 = smov 0   ;;  %s1666_s16 = smov 0  }
   0x6   :  { %s1668_s17 = smov 0   ;;  %s1670_s18 = smov 0  }
   0x7   :  { %s1672_s19 = smov 0   ;;  %s1674_s20 = smov 0  }
   0x8 LB: > { %s1695_s21 = sadd.s32 4294967295, %s1628_s20   ;;  %s1113_s22 = sadd.s32 4294967294, %s1628_s20   ;;  %s1628_s20 = sphi %s1674_s20, %s19_s20   ;;  %s1624_s19 = sphi %s1672_s19, %s2001_s19   ;;  %s1620_s18 = sphi %s1670_s18, %s2000_s18   ;;  %s1616_s17 = sphi %s1668_s17, %s1999_s17   ;;  %s1612_s16 = sphi %s1666_s16, %s1998_s16   ;;  %s1608_s15 = sphi %s1664_s15, %s1997_s15  }
   0x9   : > { %s90_s23 = sadd.s32 1, %s1616_s17  ;;  %p97_p0 = scmp.ne.s32.totalorder %s1616_s17, %s1612_s16 }
   0xa   : > { %p98_p1 = scmp.eq.s32.totalorder %s1628_s20, 0  ;;  %p103_p2 = scmp.ne.s32.totalorder %s1612_s16, %s1608_s15 }
   0xb   : > { %p104_p3 = scmp.eq.s32.totalorder %s1695_s21, 0  ;;  %p155_p4 = scmp.eq.s32.totalorder %s1695_s21, 1 }
   0xc   : > { %p1706_p5 = por %p98_p1, %p97_p0  ;;  %p161_p6 = scmp.eq.s32.totalorder %s1113_s22, 1 }
   0xd   : > { %p1712_p7 = por %p104_p3, %p103_p2  ;;  %p1716_p8 = por %p155_p4, %p97_p0 }
   0xe   : > { %p1720_p9 = por %p161_p6, %p103_p2  ;;  %p1114_p10 = scmp.ge.s32.totalorder %s1628_s20, 1 }
   0xf   : > { %s1983_s26 = scalar_select %p1716_p8, 1, 0 }
  0x10   : > { %s1984_s27 = scalar_select %p1720_p9, 1, 0 }
  0x11   : > { %p168_p11 = scmp.lt.s32.totalorder %s1628_s20, 3  ;;  %s1630_s29 = smov [#allocation2]  }
  0x12   : > { %s184_s30 = sshll.u32 %s1630_s29, 4  ;;  %p1254_p1 = scmp.lt.s32.totalorder %s1628_s20, 2  ;;  %s185_s30 = int_to_ptr.vmem [resolvable:$true] %s184_s30 }
  0x13   : > { %p1727_p13 = pnand %p1114_p10, %p168_p11  ;;  %s28_s7 = sadd.s32 1, %s1624_s19 }
  0x14   : > { %p1736_p4 = pnand %p1254_p1, %p1706_p5  ;;  %p29_p6 = scmp.ge.s32.totalorder %s28_s7, 2 }
  0x15   : > { %p1234_p0 = pneg %p1727_p13  ;;  %s208_s8 = sand.u32 1, %s1628_s20  }
  0x16   : > { %s1443_s9 = scalar_lea.vmem %s185_s30, 256  ;;  %p1451_p12 = scmp.lt.s32.totalorder %s185_s30, %s185_s30 }
  0x17   : > { %p1742_p2 = pnand %p1234_p0, %p104_p3  ;;  %p1444_p11 = scmp.ne.s32.totalorder %s185_s30, %s1443_s9 }
  0x18   : > { %p1452_p9 = scmp.lt.s32.totalorder %s1443_s9, %s1443_s9 }
  0x19   : > { %p1434_p10 = pneg %p1742_p2 }
  0x1a   : > { %p1453_p8 = por %p1452_p9, %p1451_p12 }
  0x1b   : > { %p1446_p5 = pnand %p1444_p11, %p1434_p10 }
  0x1d   : > { %p1447_p1 = pneg %p1446_p5 }
  0x1f   : > { %p1454_p0 = pnand %p1453_p8, %p1447_p1 }
  0x21   : > { %1457 = shalt.err (!%p1454_p0)
}
  0x22   : > { %s1988_s0 = sld [smem:[#allocation15_spill]]  ;;  %s2003_s7 = smov (%p29_p6, %s28_s7), 0 }
  0x23   : > { %1989 = sst [smem:[#allocation14_spill]] %s2003_s7  ;;  %s210_s12 = sand.u32 1, %s1616_s17  }
  0x24   : > { %s87_s13 = ssub.s32 %s1624_s19, %s2003_s7  ;;  %s1118_s14 = sshll.u32 %s210_s12, 9 }
  0x25   : > { %p88_p8 = scmp.eq.s32.totalorder %s87_s13, 0  ;;  %s1217_s22 = sshll.u32 %s1624_s19, 8 }
  0x26   : > { %s212_s24 = scalar_lea.vmem [#allocation7], %s1118_s14  ;;  %p1460_p9 = pneg %p1736_p4 }
  0x27   : > { %s219_s29 = sshll.u32 %s212_s24, 4  ;;  %s1631_s13 = smov [#allocation7]   ;;  %s220_s29 = int_to_ptr.vmem [resolvable:$true] %s219_s29 }
  0x28   : > { %1237 = dma.hbm_to_vmem [thread:$0]  (!%p1742_p2), %s1988_s0, 256, %s185_s30, [#allocation3]  }
  0x29   : > { %s1769_s9 = scalar_select %p88_p8, %s1616_s17, %s90_s23  }
  0x2a   : > { %s218_s30 = scalar_lea.hbm %s1972_s2, %s1217_s22  ;;  %s1776_s0 = scalar_lea.sflag [#allocation3], %s208_s8 }
  0x2b   : > { %s1471_s7 = scalar_lea.vmem %s220_s29, 8192  ;;  %s1476_s14 = sshll.u32 %s1631_s13, 4  ;;  %s1477_s14 = int_to_ptr.vmem [resolvable:$false] %s1476_s14 }
  0x2c   : > { %p1472_p12 = scmp.ne.s32.totalorder %s220_s29, %s1471_s7  ;;  %s1478_s23 = scalar_lea.vmem %s1477_s14, 16384 }
  0x2d   : > { %p1479_p5 = scmp.lt.s32.totalorder %s220_s29, %s1477_s14  ;;  %p1480_p1 = scmp.lt.s32.totalorder %s1478_s23, %s1471_s7 }
  0x2e   : > { %p1474_p6 = pnand %p1472_p12, %p1460_p9 }
  0x2f   : > { %p1481_p0 = por %p1480_p1, %p1479_p5 }
  0x30   : > { %p1475_p11 = pneg %p1474_p6 }
  0x32   : > { %p1482_p8 = pnand %p1481_p0, %p1475_p11 }
  0x34   : > { %1485 = shalt.err (!%p1482_p8)
}
  0x35   : > { %s1977_s24 = smov 512   ;;  %s1978_s8 = smov 256  }
  0x36   : > { %s1979_s10 = smov 16   ;;  %s1635_s11 = smov [#allocation5]  }
  0x37   : > { %1244 = dma.hbm_to_vmem [thread:$0]  (!%p1736_p4), %s218_s30, 8192, %s220_s29, %s1776_s0, %s1977_s24, %s1978_s8, %s1979_s10  }
  0x38   : > { %s197_s13 = sshll.u32 %s1635_s11, 4  ;;  %s1121_s14 = sshll.u32 %s210_s12, 7  ;;  %s198_s13 = int_to_ptr.vmem [resolvable:$true] %s197_s13 }
  0x39   : > { %s1497_s7 = scalar_lea.vmem %s198_s13, 128  ;;  %p1505_p5 = scmp.lt.s32.totalorder %s198_s13, %s198_s13 }
  0x3a   : > { %p1498_p12 = scmp.ne.s32.totalorder %s198_s13, %s1497_s7  ;;  %p1506_p1 = scmp.lt.s32.totalorder %s1497_s7, %s1497_s7 }
  0x3c   : > { %p1500_p6 = pnand %p1498_p12, %p1434_p10  ;;  %p1507_p0 = por %p1506_p1, %p1505_p5 }
  0x3e   : > { %p1501_p11 = pneg %p1500_p6 }
  0x40   : > { %p1508_p8 = pnand %p1507_p0, %p1501_p11 }
  0x42   : > { %1511 = shalt.err (!%p1508_p8)
}
  0x43   : > { %1240 = dma.hbm_to_vmem [thread:$0]  (!%p1742_p2), %s1971_s1, 128, %s198_s13, [#allocation6]  }
  0x44   : > { %s239_s11 = scalar_lea.hbm %s1973_s3, %s1217_s22  ;;  %s233_s24 = scalar_lea.vmem [#allocation8], %s1121_s14 }
  0x45   : > { %s240_s8 = sshll.u32 %s233_s24, 4  ;;  %s1636_s6 = smov [#allocation8]   ;;  %s241_s8 = int_to_ptr.vmem [resolvable:$true] %s240_s8 }
  0x46   : > { %s1525_s7 = scalar_lea.vmem %s241_s8, 2048  ;;  %s1530_s10 = sshll.u32 %s1636_s6, 4  ;;  %s1531_s10 = int_to_ptr.vmem [resolvable:$false] %s1530_s10 }
  0x47   : > { %p1526_p10 = scmp.ne.s32.totalorder %s241_s8, %s1525_s7  ;;  %s1532_s23 = scalar_lea.vmem %s1531_s10, 4096 }
  0x48   : > { %p1533_p11 = scmp.lt.s32.totalorder %s241_s8, %s1531_s10  ;;  %p1534_p2 = scmp.lt.s32.totalorder %s1532_s23, %s1525_s7 }
  0x49   : > { %p1528_p12 = pnand %p1526_p10, %p1460_p9 }
  0x4a   : > { %p1535_p5 = por %p1534_p2, %p1533_p11 }
  0x4b   : > { %p1529_p6 = pneg %p1528_p12 }
  0x4d   : > { %p1536_p1 = pnand %p1535_p5, %p1529_p6 }
  0x4f   : > { %1539 = shalt.err (!%p1536_p1)
}
  0x50   : > { %s1990_s22 = smov 16   ;;  %s1991_s24 = smov 256  }
  0x51   : > { %s1992_s13 = smov 512   ;;  %252 = sbr.rel (%p1727_p13) target bundleno = 385 (0x181), region = 36 }
  0x52   : > { %1247 = dma.hbm_to_vmem [thread:$0]  (!%p1736_p4), %s239_s11, 2048, %s241_s8, %s1776_s0, %s1992_s13, %s1991_s24, %s1990_s22  }
  0x56   : > { %1591 = dma.done.wait (%p104_p3), [#allocation3], 256  }
  0x57   : > { %1593 = vsyncadd (%p104_p3), [#allocation3], 4294967040 }
  0x58   : > { %1595 = dma.done.wait (%p104_p3), [#allocation6], 128  }
  0x59   : > { %1597 = vsyncadd (%p104_p3), [#allocation6], 4294967168  ;;  %s262_s5 = sand.u32 1, %s1695_s21   ;;  %s1825_s0 = sand.u32 1, %s1612_s16  }
  0x5a   : > { %s1127_s28 = sshll.u32 %s1825_s0, 9  ;;  %s263_s8 = scalar_lea.sflag [#allocation3], %s262_s5 }
  0x5b   : > { %s1828_s10 = scalar_lea.vmem [#allocation7], %s1127_s28 }
  0x5c   : > { %1599 = dma.done.wait (%p1712_p7), %s263_s8, 10240  }
  0x5d   : > { %1601 = vsyncadd (%p1712_p7), %s263_s8, 4294957056  ;;  %v1312_v0 = vld [vmem:[%s1828_s10 + $0xe4] ss:$16 sps:$4 sm:$0xff]   ;;  %v1314_v1 = vld [vmem:[%s1828_s10 + $0xec] ss:$16 sps:$4 sm:$0xff]   ;;  %s1128_s21 = sshll.u32 %s1825_s0, 7 }
  0x5e   : > { %699 = vmatprep.subr.bf16.mxu0 %v1312_v0  ;;  %v1316_v2 = vld [vmem:[%s1828_s10 + $0xe0] ss:$16 sps:$4 sm:$0xff]   ;;  %v1317_v3 = vld [vmem:[%s1828_s10 + $0xe8] ss:$16 sps:$4 sm:$0xff]   ;;  %740 = vmatprep.subr.bf16.mxu1 %v1314_v1  ;;  %v1318_v4 = vld [vmem:[%s1828_s10 + $0xc4] ss:$16 sps:$4 sm:$0xff]  }
  0x5f   : > { %700 = vmatpush1.bf16.msra.mxu0 %v1316_v2  ;;  %741 = vmatpush1.bf16.msra.mxu1 %v1317_v3  ;;  %v1320_v5 = vld [vmem:[%s1828_s10 + $0xcc] ss:$16 sps:$4 sm:$0xff]   ;;  %v1322_v6 = vld [vmem:[%s1828_s10 + $0xc0] ss:$16 sps:$4 sm:$0xff]   ;;  %v1323_v7 = vld [vmem:[%s1828_s10 + $0xc8] ss:$16 sps:$4 sm:$0xff]  }
  0x60   : > { %701 = vmatprep.subr.bf16.mxu0 %v1318_v4  ;;  %742 = vmatprep.subr.bf16.mxu1 %v1320_v5  ;;  %v1324_v8 = vld [vmem:[%s1828_s10 + $0xa4] ss:$16 sps:$4 sm:$0xff]   ;;  %v1326_v9 = vld [vmem:[%s1828_s10 + $0xac] ss:$16 sps:$4 sm:$0xff]   ;;  %v1328_v10 = vld [vmem:[%s1828_s10 + $0xa0] ss:$16 sps:$4 sm:$0xff]  }
  0x61   : > { %v1329_v11 = vld [vmem:[%s1828_s10 + $0xa8] ss:$16 sps:$4 sm:$0xff]   ;;  %v1330_v12 = vld [vmem:[%s1828_s10 + $0x84] ss:$16 sps:$4 sm:$0xff]   ;;  %v1332_v13 = vld [vmem:[%s1828_s10 + $0x8c] ss:$16 sps:$4 sm:$0xff]  }
  0x62   : > { %v1334_v14 = vld [vmem:[%s1828_s10 + $0x80] ss:$16 sps:$4 sm:$0xff]   ;;  %v1335_v15 = vld [vmem:[%s1828_s10 + $0x88] ss:$16 sps:$4 sm:$0xff]   ;;  %v1336_v16 = vld [vmem:[%s1828_s10 + $0x64] ss:$16 sps:$4 sm:$0xff]  }
  0x63   : > { %702 = vmatpush1.bf16.msra.mxu0 %v1322_v6  ;;  %743 = vmatpush1.bf16.msra.mxu1 %v1323_v7  ;;  %v1338_v17 = vld [vmem:[%s1828_s10 + $0x6c] ss:$16 sps:$4 sm:$0xff]   ;;  %v1340_v18 = vld [vmem:[%s1828_s10 + $0x60] ss:$16 sps:$4 sm:$0xff]   ;;  %v1341_v19 = vld [vmem:[%s1828_s10 + $0x68] ss:$16 sps:$4 sm:$0xff]  }
  0x64   : > { %703 = vmatprep.subr.bf16.mxu0 %v1324_v8  ;;  %744 = vmatprep.subr.bf16.mxu1 %v1326_v9  ;;  %v1342_v20 = vld [vmem:[%s1828_s10 + $0x44] ss:$16 sps:$4 sm:$0xff]   ;;  %v1344_v21 = vld [vmem:[%s1828_s10 + $0x4c] ss:$16 sps:$4 sm:$0xff]   ;;  %v1346_v22 = vld [vmem:[%s1828_s10 + $0x40] ss:$16 sps:$4 sm:$0xff]  }
  0x65   : > { %v1347_v23 = vld [vmem:[%s1828_s10 + $0x48] ss:$16 sps:$4 sm:$0xff]   ;;  %v1348_v24 = vld [vmem:[%s1828_s10 + $0x24] ss:$16 sps:$4 sm:$0xff]   ;;  %v1350_v25 = vld [vmem:[%s1828_s10 + $0x2c] ss:$16 sps:$4 sm:$0xff]  }
  0x66   : > { %v1352_v26 = vld [vmem:[%s1828_s10 + $0x20] ss:$16 sps:$4 sm:$0xff]   ;;  %v1353_v27 = vld [vmem:[%s1828_s10 + $0x28] ss:$16 sps:$4 sm:$0xff]   ;;  %v1354_v28 = vld [vmem:[%s1828_s10 + $0x4] ss:$16 sps:$4 sm:$0xff]  }
  0x67   : > { %704 = vmatpush1.bf16.msra.mxu0 %v1328_v10  ;;  %745 = vmatpush1.bf16.msra.mxu1 %v1329_v11  ;;  %v1356_v29 = vld [vmem:[%s1828_s10 + $0xc] ss:$16 sps:$4 sm:$0xff]   ;;  %v1358_v30 = vld [vmem:[%s1828_s10] ss:$16 sps:$4 sm:$0xff]   ;;  %v1359_v31 = vld [vmem:[%s1828_s10 + $0x8] ss:$16 sps:$4 sm:$0xff]  }
  0x68   : > { %705 = vmatprep.subr.bf16.mxu0 %v1330_v12  ;;  %746 = vmatprep.subr.bf16.mxu1 %v1332_v13  ;;  %v1360_v32 = vld [vmem:[%s1828_s10 + $0x1e4] ss:$16 sps:$4 sm:$0xff]   ;;  %v1362_v33 = vld [vmem:[%s1828_s10 + $0x1ec] ss:$16 sps:$4 sm:$0xff]   ;;  %v1364_v34 = vld [vmem:[%s1828_s10 + $0x1e0] ss:$16 sps:$4 sm:$0xff]  }
  0x69   : > { %v1365_v35 = vld [vmem:[%s1828_s10 + $0x1e8] ss:$16 sps:$4 sm:$0xff]   ;;  %v1366_v36 = vld [vmem:[%s1828_s10 + $0x1c4] ss:$16 sps:$4 sm:$0xff]   ;;  %v1368_v37 = vld [vmem:[%s1828_s10 + $0x1cc] ss:$16 sps:$4 sm:$0xff]  }
  0x6a   : > { %v1370_v38 = vld [vmem:[%s1828_s10 + $0x1c0] ss:$16 sps:$4 sm:$0xff]   ;;  %v1371_v39 = vld [vmem:[%s1828_s10 + $0x1c8] ss:$16 sps:$4 sm:$0xff]   ;;  %v1372_v40 = vld [vmem:[%s1828_s10 + $0x1a4] ss:$16 sps:$4 sm:$0xff]  }
  0x6b   : > { %706 = vmatpush1.bf16.msra.mxu0 %v1334_v14  ;;  %747 = vmatpush1.bf16.msra.mxu1 %v1335_v15  ;;  %v1374_v41 = vld [vmem:[%s1828_s10 + $0x1ac] ss:$16 sps:$4 sm:$0xff]   ;;  %v1376_v42 = vld [vmem:[%s1828_s10 + $0x1a0] ss:$16 sps:$4 sm:$0xff]   ;;  %v1377_v43 = vld [vmem:[%s1828_s10 + $0x1a8] ss:$16 sps:$4 sm:$0xff]  }
  0x6c   : > { %707 = vmatprep.subr.bf16.mxu0 %v1336_v16  ;;  %748 = vmatprep.subr.bf16.mxu1 %v1338_v17  ;;  %v1378_v44 = vld [vmem:[%s1828_s10 + $0x184] ss:$16 sps:$4 sm:$0xff]   ;;  %v1380_v45 = vld [vmem:[%s1828_s10 + $0x18c] ss:$16 sps:$4 sm:$0xff]   ;;  %s1881_s25 = scalar_lea.vmem [#allocation8], %s1128_s21  ;;  %v1637_v14 = vmov 0  }
  0x6d   : > { %v310_v46 = vld [vmem:[#allocation2 + $0x8] sm:$0xff]  ;;  %v1383_v49 = vld [vmem:[%s1828_s10 + $0x188] ss:$16 sps:$4 sm:$0xff]   ;;  %v1386_v51 = vld [vmem:[%s1828_s10 + $0x16c] ss:$16 sps:$4 sm:$0xff]   ;;  %vm877_vm0 = vcmask 523264  }
  0x6e   : > { %v313_v47 = vpack.c.bf16 %v310_v46, %v310_v46  ;;  %v1382_v48 = vld [vmem:[%s1828_s10 + $0x180] ss:$16 sps:$4 sm:$0xff]   ;;  %v1384_v50 = vld [vmem:[%s1828_s10 + $0x164] ss:$16 sps:$4 sm:$0xff]   ;;  %v1389_v53 = vld [vmem:[%s1828_s10 + $0x168] ss:$16 sps:$4 sm:$0xff]  }
  0x6f   : > { %708 = vmatpush1.bf16.msra.mxu0 %v1340_v18  ;;  %749 = vmatpush1.bf16.msra.mxu1 %v1341_v19  ;;  %v1388_v52 = vld [vmem:[%s1828_s10 + $0x160] ss:$16 sps:$4 sm:$0xff]   ;;  %v1390_v54 = vld [vmem:[%s1828_s10 + $0x144] ss:$16 sps:$4 sm:$0xff]   ;;  %v1392_v55 = vld [vmem:[%s1828_s10 + $0x14c] ss:$16 sps:$4 sm:$0xff]  }
  0x70   : > { %709 = vmatprep.subr.bf16.mxu0 %v1342_v20  ;;  %750 = vmatprep.subr.bf16.mxu1 %v1344_v21  ;;  %v1394_v56 = vld [vmem:[%s1828_s10 + $0x140] ss:$16 sps:$4 sm:$0xff]   ;;  %v1395_v57 = vld [vmem:[%s1828_s10 + $0x148] ss:$16 sps:$4 sm:$0xff]   ;;  %v1396_v58 = vld [vmem:[%s1828_s10 + $0x124] ss:$16 sps:$4 sm:$0xff]  }
  0x71   : > { %731 = vmatprep.mubr.bf16.mxu0 %v313_v47  ;;  %772 = vmatprep.mubr.bf16.mxu1 %v313_v47  ;;  %v1398_v59 = vld [vmem:[%s1828_s10 + $0x12c] ss:$16 sps:$4 sm:$0xff]   ;;  %v1400_v60 = vld [vmem:[%s1828_s10 + $0x120] ss:$16 sps:$4 sm:$0xff]   ;;  %v1401_v61 = vld [vmem:[%s1828_s10 + $0x128] ss:$16 sps:$4 sm:$0xff]  }
  0x72   : > { %v1402_v62 = vld [vmem:[%s1828_s10 + $0x104] ss:$16 sps:$4 sm:$0xff]   ;;  %v1404_v63 = vld [vmem:[%s1828_s10 + $0x10c] ss:$16 sps:$4 sm:$0xff]   ;;  %v1406_v0 = vld [vmem:[%s1828_s10 + $0x100] ss:$16 sps:$4 sm:$0xff]  }
  0x73   : > { %710 = vmatpush1.bf16.msra.mxu0 %v1346_v22  ;;  %751 = vmatpush1.bf16.msra.mxu1 %v1347_v23  ;;  %v1407_v1 = vld [vmem:[%s1828_s10 + $0x108] ss:$16 sps:$4 sm:$0xff]   ;;  %v1410_v3 = vld [vmem:[%s1881_s25 + $0x64] ss:$16 sps:$4 sm:$0xff]   ;;  %v1413_v4 = vld [vmem:[%s1881_s25 + $0x6c] ss:$16 sps:$4 sm:$0xff]  }
  0x74   : > { %711 = vmatprep.subr.bf16.mxu0 %v1348_v24  ;;  %752 = vmatprep.subr.bf16.mxu1 %v1350_v25  ;;  %v309_v2 = vld [vmem:[#allocation2] sm:$0xff]  ;;  %v1408_v6 = vld [vmem:[%s1881_s25 + $0x60] ss:$16 sps:$4 sm:$0xff]   ;;  %v1416_v8 = vld [vmem:[%s1881_s25 + $0x44] ss:$16 sps:$4 sm:$0xff]   ;;  %s1129_s14 = sshll.u32 %s1825_s0, 5 }
  0x75   : > { %v312_v5 = vpack.c.bf16 %v309_v2, %v309_v2  ;;  %v1411_v7 = vld [vmem:[%s1881_s25 + $0x68] ss:$16 sps:$4 sm:$0xff]   ;;  %v1419_v9 = vld [vmem:[%s1881_s25 + $0x4c] ss:$16 sps:$4 sm:$0xff]   ;;  %v1414_v10 = vld [vmem:[%s1881_s25 + $0x40] ss:$16 sps:$4 sm:$0xff]  }
  0x76   : > { %v1417_v11 = vld [vmem:[%s1881_s25 + $0x48] ss:$16 sps:$4 sm:$0xff]   ;;  %v1422_v12 = vld [vmem:[%s1881_s25 + $0x24] ss:$16 sps:$4 sm:$0xff]   ;;  %v1425_v13 = vld [vmem:[%s1881_s25 + $0x2c] ss:$16 sps:$4 sm:$0xff]  }
  0x77   : > { %712 = vmatpush1.bf16.msra.mxu0 %v1352_v26  ;;  %753 = vmatpush1.bf16.msra.mxu1 %v1353_v27  ;;  %v1420_v15 = vld [vmem:[%s1881_s25 + $0x20] ss:$16 sps:$4 sm:$0xff]   ;;  %v1423_v16 = vld [vmem:[%s1881_s25 + $0x28] ss:$16 sps:$4 sm:$0xff]   ;;  %v1428_v17 = vld [vmem:[%s1881_s25 + $0x4] ss:$16 sps:$4 sm:$0xff]  }
  0x78   : > { %713 = vmatprep.subr.bf16.mxu0 %v1354_v28  ;;  %754 = vmatprep.subr.bf16.mxu1 %v1356_v29  ;;  %v1431_v18 = vld [vmem:[%s1881_s25 + $0xc] ss:$16 sps:$4 sm:$0xff]   ;;  %v1426_v19 = vld [vmem:[%s1881_s25] ss:$16 sps:$4 sm:$0xff]   ;;  %v1429_v20 = vld [vmem:[%s1881_s25 + $0x8] ss:$16 sps:$4 sm:$0xff]  }
  0x79   : > { %v311_v21 = vld [vmem:[#allocation5] sm:$0xff]  ;;  %s1219_s29 = sshll.u32 %s1620_s18, 9  ;;  %s304_s12 = scalar_lea.vmem [#allocation9], %s1129_s14 }
  0x7a   : > { %v314_v22 = vpack.c.bf16 %v311_v21, %v311_v21  ;;  %s988_s30 = sshll.u32 %s304_s12, 4  ;;  %s1922_s6 = scalar_lea.hbm %s1974_s4, %s1219_s29  ;;  %s1924_s30 = int_to_ptr.vmem [resolvable:$true] %s988_s30 }
  0x7b   : > { %714 = vmatpush1.bf16.msra.mxu0 %v1358_v30  ;;  %755 = vmatpush1.bf16.msra.mxu1 %v1359_v31  ;;  %s972_s18 = scalar_lea.sflag [#allocation4], %s1825_s0  ;;  %s1540_s23 = scalar_lea.vmem %s1924_s30, 512 }
  0x7c   : > { %715 = vmatprep.subr.bf16.mxu0 %v1360_v32  ;;  %756 = vmatprep.subr.bf16.mxu1 %v1362_v33  ;;  %p1541_p3 = scmp.ne.s32.totalorder %s1924_s30, %s1540_s23  ;;  %p1993_p7 = scmp.ne.s32.totalorder %s1983_s26, 0 }
  0x7d   : > { %s1638_s22 = smov [#allocation9]  }
  0x7e   : > { %p1542_p13 = pnand %p1541_p3, %p1993_p7  ;;  %s1544_s24 = sshll.u32 %s1638_s22, 4  ;;  %s1545_s24 = int_to_ptr.vmem [resolvable:$false] %s1544_s24 }
  0x7f   : > { %716 = vmatpush2.bf16.msra.mxu0 %v1364_v34  ;;  %757 = vmatpush2.bf16.msra.mxu1 %v1365_v35  ;;  %s1546_s13 = scalar_lea.vmem %s1545_s24, 1024  ;;  %p1547_p9 = scmp.lt.s32.totalorder %s1924_s30, %s1545_s24 }
  0x80   : > { %717 = vmatprep.subr.bf16.mxu0 %v1366_v36  ;;  %758 = vmatprep.subr.bf16.mxu1 %v1368_v37  ;;  %p1543_p4 = pneg %p1542_p13  ;;  %p1548_p0 = scmp.lt.s32.totalorder %s1546_s13, %s1540_s23 }
  0x82   : > { %p1549_p8 = por %p1548_p0, %p1547_p9 }
  0x83   : > { %718 = vmatpush2.bf16.msra.mxu0 %v1370_v38  ;;  %759 = vmatpush2.bf16.msra.mxu1 %v1371_v39 }
  0x84   : > { %719 = vmatprep.subr.bf16.mxu0 %v1372_v40  ;;  %760 = vmatprep.subr.bf16.mxu1 %v1374_v41  ;;  %p1550_p10 = pnand %p1549_p8, %p1543_p4 }
  0x87   : > { %720 = vmatpush2.bf16.msra.mxu0 %v1376_v42  ;;  %761 = vmatpush2.bf16.msra.mxu1 %v1377_v43 }
  0x88   : > { %721 = vmatprep.subr.bf16.mxu0 %v1378_v44  ;;  %762 = vmatprep.subr.bf16.mxu1 %v1380_v45 }
  0x8b   : > { %722 = vmatpush2.bf16.msra.mxu0 %v1382_v48  ;;  %763 = vmatpush2.bf16.msra.mxu1 %v1383_v49 }
  0x8c   : > { %723 = vmatprep.subr.bf16.mxu0 %v1384_v50  ;;  %764 = vmatprep.subr.bf16.mxu1 %v1386_v51 }
  0x8f   : > { %724 = vmatpush2.bf16.msra.mxu0 %v1388_v52  ;;  %765 = vmatpush2.bf16.msra.mxu1 %v1389_v53 }
  0x90   : > { %725 = vmatprep.subr.bf16.mxu0 %v1390_v54  ;;  %766 = vmatprep.subr.bf16.mxu1 %v1392_v55 }
  0x93   : > { %726 = vmatpush2.bf16.msra.mxu0 %v1394_v56  ;;  %767 = vmatpush2.bf16.msra.mxu1 %v1395_v57 }
  0x94   : > { %727 = vmatprep.subr.bf16.mxu0 %v1396_v58  ;;  %768 = vmatprep.subr.bf16.mxu1 %v1398_v59 }
  0x97   : > { %728 = vmatpush2.bf16.msra.mxu0 %v1400_v60  ;;  %769 = vmatpush2.bf16.msra.mxu1 %v1401_v61 }
  0x98   : > { %729 = vmatprep.subr.bf16.mxu0 %v1402_v62  ;;  %770 = vmatprep.subr.bf16.mxu1 %v1404_v63 }
  0x9b   : > { %730 = vmatpush2.bf16.msra.mxu0 %v1406_v0  ;;  %771 = vmatpush2.bf16.msra.mxu1 %v1407_v1 }
  0x9c   : > { %889 = vmatprep.subr.bf16.mxu0 %v1410_v3  ;;  %930 = vmatprep.subr.bf16.mxu1 %v1413_v4 }
  0x9e   : > { %732 = vmatmul.mubr.bf16.vlgmr.msra.gmra.mxu0 %v312_v5  ;;  %773 = vmatmul.mubr.bf16.vlgmr.msra.gmra.mxu1 %v312_v5 }
  0x9f   : > { %890 = vmatpush1.bf16.msra.mxu0 %v1408_v6  ;;  %931 = vmatpush1.bf16.msra.mxu1 %v1411_v7 }
  0xa0   : > { %891 = vmatprep.subr.bf16.mxu0 %v1416_v8  ;;  %932 = vmatprep.subr.bf16.mxu1 %v1419_v9 }
  0xa1   : > { %913 = vmatprep.mubr.bf16.mxu0 %v1637_v14  ;;  %954 = vmatprep.mubr.bf16.mxu1 %v1637_v14 }
  0xa3   : > { %892 = vmatpush1.bf16.msra.mxu0 %v1414_v10  ;;  %933 = vmatpush1.bf16.msra.mxu1 %v1417_v11 }
  0xa4   : > { %893 = vmatprep.subr.bf16.mxu0 %v1422_v12  ;;  %934 = vmatprep.subr.bf16.mxu1 %v1425_v13 }
  0xa7   : > { %894 = vmatpush1.bf16.msra.mxu0 %v1420_v15  ;;  %935 = vmatpush1.bf16.msra.mxu1 %v1423_v16 }
  0xa8   : > { %895 = vmatprep.subr.bf16.mxu0 %v1428_v17  ;;  %936 = vmatprep.subr.bf16.mxu1 %v1431_v18 }
  0xab   : > { %896 = vmatpush1.bf16.msra.mxu0 %v1426_v19  ;;  %937 = vmatpush1.bf16.msra.mxu1 %v1429_v20 }
  0xae   : > { %1210 = vmatmul.mubr.msk.bf16.vlgmr.msra.gmra.mxu0 %vm877_vm0, %v314_v22  ;;  %1211 = vmatmul.mubr.msk.bf16.vlgmr.msra.gmra.mxu1 %vm877_vm0, %v314_v22 }
 0x15e   : > { %v733_v23 = vpop.f32.mrf.mxu0  ;;  %v774_v24 = vpop.f32.mrf.mxu1 }
 0x160   : > { %v735_v25 = vpop.f32.mrf.mxu0  ;;  %v776_v26 = vpop.f32.mrf.mxu1 }
 0x162   : > { %v737_v27 = vpop.f32.mrf.mxu0  ;;  %v778_v28 = vpop.f32.mrf.mxu1 }
 0x164   : > { %v738_v29 = vpop.f32.mrf.mxu0  ;;  %v779_v30 = vpop.f32.mrf.mxu1 }
 0x16e   : > { %v915_v31 = vpop.f32.mrf.mxu0  ;;  %v956_v32 = vpop.f32.mrf.mxu1 }
 0x16f   : > { %v963_v33 = vmul.f32 %v915_v31, %v733_v23  ;;  %v965_v34 = vmul.f32 %v956_v32, %v774_v24 }
 0x170   : > { %v917_v35 = vpop.f32.mrf.mxu0  ;;  %v958_v36 = vpop.f32.mrf.mxu1 }
 0x171   : > { %967 = vst [vmem:[%s304_s12] sm:$0xff] %v963_v33  ;;  %969 = vst [vmem:[%s304_s12 + $0x10] sm:$0xff] %v965_v34  ;;  %v964_v37 = vmul.f32 %v917_v35, %v735_v25  ;;  %v966_v38 = vmul.f32 %v958_v36, %v776_v26 }
 0x172   : > { %v919_v39 = vpop.f32.mrf.mxu0  ;;  %v960_v40 = vpop.f32.mrf.mxu1 }
 0x173   : > { %968 = vst [vmem:[%s304_s12 + $0x8] sm:$0xff] %v964_v37  ;;  %970 = vst [vmem:[%s304_s12 + $0x18] sm:$0xff] %v966_v38 }
 0x174   : > { %v920_v41 = vpop.f32.mrf.mxu0  ;;  %v961_v42 = vpop.f32.mrf.mxu1 }
 0x175   : > { %1553 = shalt.err (!%p1550_p10)
}
 0x176   : > { %s1554_s5 = scalar_lea.hbm %s1922_s6, 512  ;;  %s1558_s8 = scalar_lea.hbm %s1974_s4, 1024 }
 0x177   : > { %p1555_p12 = scmp.ne.s32.totalorder %s1922_s6, %s1554_s5  ;;  %p1559_p2 = scmp.lt.s32.totalorder %s1922_s6, %s1974_s4 }
 0x178   : > { %p1560_p5 = scmp.lt.s32.totalorder %s1558_s8, %s1554_s5 }
 0x179   : > { %p1556_p6 = pnand %p1555_p12, %p1993_p7 }
 0x17a   : > { %p1561_p1 = por %p1560_p5, %p1559_p2 }
 0x17b   : > { %p1557_p11 = pneg %p1556_p6 }
 0x17d   : > { %p1562_p3 = pnand %p1561_p1, %p1557_p11 }
 0x17f   : > { %1565 = shalt.err (!%p1562_p3)
}
 0x180   : > { %1232 = dma.vmem_to_hbm [thread:$0]  (%p1993_p7), %s1924_s30, 512, %s1922_s6, %s972_s18  }
 0x181 PF: > { %s1000_s25 = sand.u32 1, %s1608_s15   ;;  %p1994_p13 = scmp.ne.s32.totalorder %s1984_s27, 0 }
 0x182   : > { %p1995_p4 = scmp.ge.s32.totalorder %s1628_s20, 2  ;;  %s1001_s14 = scalar_lea.sflag [#allocation4], %s1000_s25 }
 0x184   : > { %p1249_p9 = pnand %p1995_p4, %p1994_p13 }
 0x186   : > { %p1250_p0 = pneg %p1249_p9 }
 0x188   : > { %1603 = dma.done.wait (%p1250_p0), %s1001_s14, 512  }
 0x189   : > { %1605 = vsyncadd (%p1250_p0), %s1001_s14, 4294966784  ;;  %s19_s20 = sadd.s32 1, %s1628_s20   ;;  %s1996_s26 = sld [smem:[#allocation14_spill]] }
 0x18a   : > { %p16_p8 = scmp.ge.s32.totalorder %s19_s20, 4   ;;  %s1997_s15 = smov %s1612_s16 }
 0x18b   : > { %s1998_s16 = smov %s1616_s17  ;;  %s1999_s17 = smov %s1769_s9 }
 0x18c   : > { %s2000_s18 = smov %s1624_s19  ;;  %18 = sbr.rel (!%p16_p8) target bundleno = 8 (0x8), region = 101 }
 0x18f   : > { %s2001_s19 = smov %s1996_s26 }
 0x191   :  { %1006 = vsyncpa [#allocation3], 1 }
 0x192   :  { %1008 = vsyncpa [#allocation3 + $0x1], 1 }
 0x193   :  { %1009 = vsyncpa [#allocation6], 1 }
 0x194   :  { %1010 = vsyncpa [#allocation4], 1 }
 0x195   :  { %1012 = vsyncpa [#allocation4 + $0x1], 1 }

// kernel: tpu_custom_call.1
= control target key start
LH: loop header
LB: loop body
LE: loop exit
PB: predicated region body
PF: predicated region fallthrough
CT: control target
= control target key end

     0   :  { %s1970_s0 = inlined_call_operand.hbm [shape: f32[8,256], index: 0, kind: input, shape index: {}]   ;;  %s1971_s1 = inlined_call_operand.hbm [shape: f32[8,64], index: 1, kind: input, shape index: {}]   ;;  %s1972_s2 = inlined_call_operand.hbm [shape: bf16[256,1024], index: 2, kind: input, shape index: {}]   ;;  %s1973_s3 = inlined_call_operand.hbm [shape: bf16[64,1024], index: 3, kind: input, shape index: {}]   ;;  %s1974_s4 = inlined_call_operand.hbm [shape: f32[8,1024], index: 4, kind: output, shape index: {}]  }
   0x1   :  { %1980 = sst [smem:[#allocation15_spill]] %s1970_s0 }
   0x2   :  { %9 = vsyncpa [#allocation3], 0 }
   0x3   :  { %10 = vsyncpa [#allocation6], 0 }
   0x4   :  { %11 = vsyncpa [#allocation4], 0 }
   0x5   :  { %13 = vsyncpa [#allocation4 + $0x1], 0  ;;  %s1664_s15 = smov 0   ;;  %s1666_s16 = smov 0  }
   0x6   :  { %s1668_s17 = smov 0   ;;  %s1670_s18 = smov 0  }
   0x7   :  { %s1672_s19 = smov 0   ;;  %s1674_s20 = smov 0  }
   0x8 LB: > { %s1695_s21 = sadd.s32 4294967295, %s1628_s20   ;;  %s1113_s22 = sadd.s32 4294967294, %s1628_s20   ;;  %s1628_s20 = sphi %s1674_s20, %s19_s20   ;;  %s1624_s19 = sphi %s1672_s19, %s2001_s19   ;;  %s1620_s18 = sphi %s1670_s18, %s2000_s18   ;;  %s1616_s17 = sphi %s1668_s17, %s1999_s17   ;;  %s1612_s16 = sphi %s1666_s16, %s1998_s16   ;;  %s1608_s15 = sphi %s1664_s15, %s1997_s15  }
   0x9   : > { %s90_s23 = sadd.s32 1, %s1616_s17  ;;  %p97_p0 = scmp.ne.s32.totalorder %s1616_s17, %s1612_s16 }
   0xa   : > { %p98_p1 = scmp.eq.s32.totalorder %s1628_s20, 0  ;;  %p103_p2 = scmp.ne.s32.totalorder %s1612_s16, %s1608_s15 }
   0xb   : > { %p104_p3 = scmp.eq.s32.totalorder %s1695_s21, 0  ;;  %p155_p4 = scmp.eq.s32.totalorder %s1695_s21, 1 }
   0xc   : > { %p1706_p5 = por %p98_p1, %p97_p0  ;;  %p161_p6 = scmp.eq.s32.totalorder %s1113_s22, 1 }
   0xd   : > { %p1712_p7 = por %p104_p3, %p103_p2  ;;  %p1716_p8 = por %p155_p4, %p97_p0 }
   0xe   : > { %p1720_p9 = por %p161_p6, %p103_p2  ;;  %p1114_p10 = scmp.ge.s32.totalorder %s1628_s20, 1 }
   0xf   : > { %s1983_s26 = scalar_select %p1716_p8, 1, 0 }
  0x10   : > { %s1984_s27 = scalar_select %p1720_p9, 1, 0 }
  0x11   : > { %p168_p11 = scmp.lt.s32.totalorder %s1628_s20, 3  ;;  %s1630_s29 = smov [#allocation2]  }
  0x12   : > { %s184_s30 = sshll.u32 %s1630_s29, 4  ;;  %p1254_p1 = scmp.lt.s32.totalorder %s1628_s20, 2  ;;  %s185_s30 = int_to_ptr.vmem [resolvable:$true] %s184_s30 }
  0x13   : > { %p1727_p13 = pnand %p1114_p10, %p168_p11  ;;  %s28_s7 = sadd.s32 1, %s1624_s19 }
  0x14   : > { %p1736_p4 = pnand %p1254_p1, %p1706_p5  ;;  %p29_p6 = scmp.ge.s32.totalorder %s28_s7, 2 }
  0x15   : > { %p1234_p0 = pneg %p1727_p13  ;;  %s208_s8 = sand.u32 1, %s1628_s20  }
  0x16   : > { %s1443_s9 = scalar_lea.vmem %s185_s30, 256  ;;  %p1451_p12 = scmp.lt.s32.totalorder %s185_s30, %s185_s30 }
  0x17   : > { %p1742_p2 = pnand %p1234_p0, %p104_p3  ;;  %p1444_p11 = scmp.ne.s32.totalorder %s185_s30, %s1443_s9 }
  0x18   : > { %p1452_p9 = scmp.lt.s32.totalorder %s1443_s9, %s1443_s9 }
  0x19   : > { %p1434_p10 = pneg %p1742_p2 }
  0x1a   : > { %p1453_p8 = por %p1452_p9, %p1451_p12 }
  0x1b   : > { %p1446_p5 = pnand %p1444_p11, %p1434_p10 }
  0x1d   : > { %p1447_p1 = pneg %p1446_p5 }
  0x1f   : > { %p1454_p0 = pnand %p1453_p8, %p1447_p1 }
  0x21   : > { %1457 = shalt.err (!%p1454_p0)
}
  0x22   : > { %s1988_s0 = sld [smem:[#allocation15_spill]]  ;;  %s2003_s7 = smov (%p29_p6, %s28_s7), 0 }
  0x23   : > { %1989 = sst [smem:[#allocation14_spill]] %s2003_s7  ;;  %s210_s12 = sand.u32 1, %s1616_s17  }
  0x24   : > { %s87_s13 = ssub.s32 %s1624_s19, %s2003_s7  ;;  %s1118_s14 = sshll.u32 %s210_s12, 9 }
  0x25   : > { %p88_p8 = scmp.eq.s32.totalorder %s87_s13, 0  ;;  %s1217_s22 = sshll.u32 %s1624_s19, 8 }
  0x26   : > { %s212_s24 = scalar_lea.vmem [#allocation7], %s1118_s14  ;;  %p1460_p9 = pneg %p1736_p4 }
  0x27   : > { %s219_s29 = sshll.u32 %s212_s24, 4  ;;  %s1631_s13 = smov [#allocation7]   ;;  %s220_s29 = int_to_ptr.vmem [resolvable:$true] %s219_s29 }
  0x28   : > { %1237 = dma.hbm_to_vmem [thread:$0]  (!%p1742_p2), %s1988_s0, 256, %s185_s30, [#allocation3]  }
  0x29   : > { %s1769_s9 = scalar_select %p88_p8, %s1616_s17, %s90_s23  }
  0x2a   : > { %s218_s30 = scalar_lea.hbm %s1972_s2, %s1217_s22  ;;  %s1776_s0 = scalar_lea.sflag [#allocation3], %s208_s8 }
  0x2b   : > { %s1471_s7 = scalar_lea.vmem %s220_s29, 8192  ;;  %s1476_s14 = sshll.u32 %s1631_s13, 4  ;;  %s1477_s14 = int_to_ptr.vmem [resolvable:$false] %s1476_s14 }
  0x2c   : > { %p1472_p12 = scmp.ne.s32.totalorder %s220_s29, %s1471_s7  ;;  %s1478_s23 = scalar_lea.vmem %s1477_s14, 16384 }
  0x2d   : > { %p1479_p5 = scmp.lt.s32.totalorder %s220_s29, %s1477_s14  ;;  %p1480_p1 = scmp.lt.s32.totalorder %s1478_s23, %s1471_s7 }
  0x2e   : > { %p1474_p6 = pnand %p1472_p12, %p1460_p9 }
  0x2f   : > { %p1481_p0 = por %p1480_p1, %p1479_p5 }
  0x30   : > { %p1475_p11 = pneg %p1474_p6 }
  0x32   : > { %p1482_p8 = pnand %p1481_p0, %p1475_p11 }
  0x34   : > { %1485 = shalt.err (!%p1482_p8)
}
  0x35   : > { %s1977_s24 = smov 512   ;;  %s1978_s8 = smov 256  }
  0x36   : > { %s1979_s10 = smov 16   ;;  %s1635_s11 = smov [#allocation5]  }
  0x37   : > { %1244 = dma.hbm_to_vmem [thread:$0]  (!%p1736_p4), %s218_s30, 8192, %s220_s29, %s1776_s0, %s1977_s24, %s1978_s8, %s1979_s10  }
  0x38   : > { %s197_s13 = sshll.u32 %s1635_s11, 4  ;;  %s1121_s14 = sshll.u32 %s210_s12, 7  ;;  %s198_s13 = int_to_ptr.vmem [resolvable:$true] %s197_s13 }
  0x39   : > { %s1497_s7 = scalar_lea.vmem %s198_s13, 128  ;;  %p1505_p5 = scmp.lt.s32.totalorder %s198_s13, %s198_s13 }
  0x3a   : > { %p1498_p12 = scmp.ne.s32.totalorder %s198_s13, %s1497_s7  ;;  %p1506_p1 = scmp.lt.s32.totalorder %s1497_s7, %s1497_s7 }
  0x3c   : > { %p1500_p6 = pnand %p1498_p12, %p1434_p10  ;;  %p1507_p0 = por %p1506_p1, %p1505_p5 }
  0x3e   : > { %p1501_p11 = pneg %p1500_p6 }
  0x40   : > { %p1508_p8 = pnand %p1507_p0, %p1501_p11 }
  0x42   : > { %1511 = shalt.err (!%p1508_p8)
}
  0x43   : > { %1240 = dma.hbm_to_vmem [thread:$0]  (!%p1742_p2), %s1971_s1, 128, %s198_s13, [#allocation6]  }
  0x44   : > { %s239_s11 = scalar_lea.hbm %s1973_s3, %s1217_s22  ;;  %s233_s24 = scalar_lea.vmem [#allocation8], %s1121_s14 }
  0x45   : > { %s240_s8 = sshll.u32 %s233_s24, 4  ;;  %s1636_s6 = smov [#allocation8]   ;;  %s241_s8 = int_to_ptr.vmem [resolvable:$true] %s240_s8 }
  0x46   : > { %s1525_s7 = scalar_lea.vmem %s241_s8, 2048  ;;  %s1530_s10 = sshll.u32 %s1636_s6, 4  ;;  %s1531_s10 = int_to_ptr.vmem [resolvable:$false] %s1530_s10 }
  0x47   : > { %p1526_p10 = scmp.ne.s32.totalorder %s241_s8, %s1525_s7  ;;  %s1532_s23 = scalar_lea.vmem %s1531_s10, 4096 }
  0x48   : > { %p1533_p11 = scmp.lt.s32.totalorder %s241_s8, %s1531_s10  ;;  %p1534_p2 = scmp.lt.s32.totalorder %s1532_s23, %s1525_s7 }
  0x49   : > { %p1528_p12 = pnand %p1526_p10, %p1460_p9 }
  0x4a   : > { %p1535_p5 = por %p1534_p2, %p1533_p11 }
  0x4b   : > { %p1529_p6 = pneg %p1528_p12 }
  0x4d   : > { %p1536_p1 = pnand %p1535_p5, %p1529_p6 }
  0x4f   : > { %1539 = shalt.err (!%p1536_p1)
}
  0x50   : > { %s1990_s22 = smov 16   ;;  %s1991_s24 = smov 256  }
  0x51   : > { %s1992_s13 = smov 512   ;;  %252 = sbr.rel (%p1727_p13) target bundleno = 385 (0x181), region = 36 }
  0x52   : > { %1247 = dma.hbm_to_vmem [thread:$0]  (!%p1736_p4), %s239_s11, 2048, %s241_s8, %s1776_s0, %s1992_s13, %s1991_s24, %s1990_s22  }
  0x56   : > { %1591 = dma.done.wait (%p104_p3), [#allocation3], 256  }
  0x57   : > { %1593 = vsyncadd (%p104_p3), [#allocation3], 4294967040 }
  0x58   : > { %1595 = dma.done.wait (%p104_p3), [#allocation6], 128  }
  0x59   : > { %1597 = vsyncadd (%p104_p3), [#allocation6], 4294967168  ;;  %s262_s5 = sand.u32 1, %s1695_s21   ;;  %s1825_s0 = sand.u32 1, %s1612_s16  }
  0x5a   : > { %s1127_s28 = sshll.u32 %s1825_s0, 9  ;;  %s263_s8 = scalar_lea.sflag [#allocation3], %s262_s5 }
  0x5b   : > { %s1828_s10 = scalar_lea.vmem [#allocation7], %s1127_s28 }
  0x5c   : > { %1599 = dma.done.wait (%p1712_p7), %s263_s8, 10240  }
  0x5d   : > { %1601 = vsyncadd (%p1712_p7), %s263_s8, 4294957056  ;;  %v1312_v0 = vld [vmem:[%s1828_s10 + $0xe4] ss:$16 sps:$4 sm:$0xff]   ;;  %v1314_v1 = vld [vmem:[%s1828_s10 + $0xec] ss:$16 sps:$4 sm:$0xff]   ;;  %s1128_s21 = sshll.u32 %s1825_s0, 7 }
  0x5e   : > { %699 = vmatprep.subr.bf16.mxu0 %v1312_v0  ;;  %v1316_v2 = vld [vmem:[%s1828_s10 + $0xe0] ss:$16 sps:$4 sm:$0xff]   ;;  %v1317_v3 = vld [vmem:[%s1828_s10 + $0xe8] ss:$16 sps:$4 sm:$0xff]   ;;  %740 = vmatprep.subr.bf16.mxu1 %v1314_v1  ;;  %v1318_v4 = vld [vmem:[%s1828_s10 + $0xc4] ss:$16 sps:$4 sm:$0xff]  }
  0x5f   : > { %700 = vmatpush1.bf16.msra.mxu0 %v1316_v2  ;;  %741 = vmatpush1.bf16.msra.mxu1 %v1317_v3  ;;  %v1320_v5 = vld [vmem:[%s1828_s10 + $0xcc] ss:$16 sps:$4 sm:$0xff]   ;;  %v1322_v6 = vld [vmem:[%s1828_s10 + $0xc0] ss:$16 sps:$4 sm:$0xff]   ;;  %v1323_v7 = vld [vmem:[%s1828_s10 + $0xc8] ss:$16 sps:$4 sm:$0xff]  }
  0x60   : > { %701 = vmatprep.subr.bf16.mxu0 %v1318_v4  ;;  %742 = vmatprep.subr.bf16.mxu1 %v1320_v5  ;;  %v1324_v8 = vld [vmem:[%s1828_s10 + $0xa4] ss:$16 sps:$4 sm:$0xff]   ;;  %v1326_v9 = vld [vmem:[%s1828_s10 + $0xac] ss:$16 sps:$4 sm:$0xff]   ;;  %v1328_v10 = vld [vmem:[%s1828_s10 + $0xa0] ss:$16 sps:$4 sm:$0xff]  }
  0x61   : > { %v1329_v11 = vld [vmem:[%s1828_s10 + $0xa8] ss:$16 sps:$4 sm:$0xff]   ;;  %v1330_v12 = vld [vmem:[%s1828_s10 + $0x84] ss:$16 sps:$4 sm:$0xff]   ;;  %v1332_v13 = vld [vmem:[%s1828_s10 + $0x8c] ss:$16 sps:$4 sm:$0xff]  }
  0x62   : > { %v1334_v14 = vld [vmem:[%s1828_s10 + $0x80] ss:$16 sps:$4 sm:$0xff]   ;;  %v1335_v15 = vld [vmem:[%s1828_s10 + $0x88] ss:$16 sps:$4 sm:$0xff]   ;;  %v1336_v16 = vld [vmem:[%s1828_s10 + $0x64] ss:$16 sps:$4 sm:$0xff]  }
  0x63   : > { %702 = vmatpush1.bf16.msra.mxu0 %v1322_v6  ;;  %743 = vmatpush1.bf16.msra.mxu1 %v1323_v7  ;;  %v1338_v17 = vld [vmem:[%s1828_s10 + $0x6c] ss:$16 sps:$4 sm:$0xff]   ;;  %v1340_v18 = vld [vmem:[%s1828_s10 + $0x60] ss:$16 sps:$4 sm:$0xff]   ;;  %v1341_v19 = vld [vmem:[%s1828_s10 + $0x68] ss:$16 sps:$4 sm:$0xff]  }
  0x64   : > { %703 = vmatprep.subr.bf16.mxu0 %v1324_v8  ;;  %744 = vmatprep.subr.bf16.mxu1 %v1326_v9  ;;  %v1342_v20 = vld [vmem:[%s1828_s10 + $0x44] ss:$16 sps:$4 sm:$0xff]   ;;  %v1344_v21 = vld [vmem:[%s1828_s10 + $0x4c] ss:$16 sps:$4 sm:$0xff]   ;;  %v1346_v22 = vld [vmem:[%s1828_s10 + $0x40] ss:$16 sps:$4 sm:$0xff]  }
  0x65   : > { %v1347_v23 = vld [vmem:[%s1828_s10 + $0x48] ss:$16 sps:$4 sm:$0xff]   ;;  %v1348_v24 = vld [vmem:[%s1828_s10 + $0x24] ss:$16 sps:$4 sm:$0xff]   ;;  %v1350_v25 = vld [vmem:[%s1828_s10 + $0x2c] ss:$16 sps:$4 sm:$0xff]  }
  0x66   : > { %v1352_v26 = vld [vmem:[%s1828_s10 + $0x20] ss:$16 sps:$4 sm:$0xff]   ;;  %v1353_v27 = vld [vmem:[%s1828_s10 + $0x28] ss:$16 sps:$4 sm:$0xff]   ;;  %v1354_v28 = vld [vmem:[%s1828_s10 + $0x4] ss:$16 sps:$4 sm:$0xff]  }
  0x67   : > { %704 = vmatpush1.bf16.msra.mxu0 %v1328_v10  ;;  %745 = vmatpush1.bf16.msra.mxu1 %v1329_v11  ;;  %v1356_v29 = vld [vmem:[%s1828_s10 + $0xc] ss:$16 sps:$4 sm:$0xff]   ;;  %v1358_v30 = vld [vmem:[%s1828_s10] ss:$16 sps:$4 sm:$0xff]   ;;  %v1359_v31 = vld [vmem:[%s1828_s10 + $0x8] ss:$16 sps:$4 sm:$0xff]  }
  0x68   : > { %705 = vmatprep.subr.bf16.mxu0 %v1330_v12  ;;  %746 = vmatprep.subr.bf16.mxu1 %v1332_v13  ;;  %v1360_v32 = vld [vmem:[%s1828_s10 + $0x1e4] ss:$16 sps:$4 sm:$0xff]   ;;  %v1362_v33 = vld [vmem:[%s1828_s10 + $0x1ec] ss:$16 sps:$4 sm:$0xff]   ;;  %v1364_v34 = vld [vmem:[%s1828_s10 + $0x1e0] ss:$16 sps:$4 sm:$0xff]  }
  0x69   : > { %v1365_v35 = vld [vmem:[%s1828_s10 + $0x1e8] ss:$16 sps:$4 sm:$0xff]   ;;  %v1366_v36 = vld [vmem:[%s1828_s10 + $0x1c4] ss:$16 sps:$4 sm:$0xff]   ;;  %v1368_v37 = vld [vmem:[%s1828_s10 + $0x1cc] ss:$16 sps:$4 sm:$0xff]  }
  0x6a   : > { %v1370_v38 = vld [vmem:[%s1828_s10 + $0x1c0] ss:$16 sps:$4 sm:$0xff]   ;;  %v1371_v39 = vld [vmem:[%s1828_s10 + $0x1c8] ss:$16 sps:$4 sm:$0xff]   ;;  %v1372_v40 = vld [vmem:[%s1828_s10 + $0x1a4] ss:$16 sps:$4 sm:$0xff]  }
  0x6b   : > { %706 = vmatpush1.bf16.msra.mxu0 %v1334_v14  ;;  %747 = vmatpush1.bf16.msra.mxu1 %v1335_v15  ;;  %v1374_v41 = vld [vmem:[%s1828_s10 + $0x1ac] ss:$16 sps:$4 sm:$0xff]   ;;  %v1376_v42 = vld [vmem:[%s1828_s10 + $0x1a0] ss:$16 sps:$4 sm:$0xff]   ;;  %v1377_v43 = vld [vmem:[%s1828_s10 + $0x1a8] ss:$16 sps:$4 sm:$0xff]  }
  0x6c   : > { %707 = vmatprep.subr.bf16.mxu0 %v1336_v16  ;;  %748 = vmatprep.subr.bf16.mxu1 %v1338_v17  ;;  %v1378_v44 = vld [vmem:[%s1828_s10 + $0x184] ss:$16 sps:$4 sm:$0xff]   ;;  %v1380_v45 = vld [vmem:[%s1828_s10 + $0x18c] ss:$16 sps:$4 sm:$0xff]   ;;  %s1881_s25 = scalar_lea.vmem [#allocation8], %s1128_s21  ;;  %v1637_v14 = vmov 0  }
  0x6d   : > { %v310_v46 = vld [vmem:[#allocation2 + $0x8] sm:$0xff]  ;;  %v1383_v49 = vld [vmem:[%s1828_s10 + $0x188] ss:$16 sps:$4 sm:$0xff]   ;;  %v1386_v51 = vld [vmem:[%s1828_s10 + $0x16c] ss:$16 sps:$4 sm:$0xff]   ;;  %vm877_vm0 = vcmask 523264  }
  0x6e   : > { %v313_v47 = vpack.c.bf16 %v310_v46, %v310_v46  ;;  %v1382_v48 = vld [vmem:[%s1828_s10 + $0x180] ss:$16 sps:$4 sm:$0xff]   ;;  %v1384_v50 = vld [vmem:[%s1828_s10 + $0x164] ss:$16 sps:$4 sm:$0xff]   ;;  %v1389_v53 = vld [vmem:[%s1828_s10 + $0x168] ss:$16 sps:$4 sm:$0xff]  }
  0x6f   : > { %708 = vmatpush1.bf16.msra.mxu0 %v1340_v18  ;;  %749 = vmatpush1.bf16.msra.mxu1 %v1341_v19  ;;  %v1388_v52 = vld [vmem:[%s1828_s10 + $0x160] ss:$16 sps:$4 sm:$0xff]   ;;  %v1390_v54 = vld [vmem:[%s1828_s10 + $0x144] ss:$16 sps:$4 sm:$0xff]   ;;  %v1392_v55 = vld [vmem:[%s1828_s10 + $0x14c] ss:$16 sps:$4 sm:$0xff]  }
  0x70   : > { %709 = vmatprep.subr.bf16.mxu0 %v1342_v20  ;;  %750 = vmatprep.subr.bf16.mxu1 %v1344_v21  ;;  %v1394_v56 = vld [vmem:[%s1828_s10 + $0x140] ss:$16 sps:$4 sm:$0xff]   ;;  %v1395_v57 = vld [vmem:[%s1828_s10 + $0x148] ss:$16 sps:$4 sm:$0xff]   ;;  %v1396_v58 = vld [vmem:[%s1828_s10 + $0x124] ss:$16 sps:$4 sm:$0xff]  }
  0x71   : > { %731 = vmatprep.mubr.bf16.mxu0 %v313_v47  ;;  %772 = vmatprep.mubr.bf16.mxu1 %v313_v47  ;;  %v1398_v59 = vld [vmem:[%s1828_s10 + $0x12c] ss:$16 sps:$4 sm:$0xff]   ;;  %v1400_v60 = vld [vmem:[%s1828_s10 + $0x120] ss:$16 sps:$4 sm:$0xff]   ;;  %v1401_v61 = vld [vmem:[%s1828_s10 + $0x128] ss:$16 sps:$4 sm:$0xff]  }
  0x72   : > { %v1402_v62 = vld [vmem:[%s1828_s10 + $0x104] ss:$16 sps:$4 sm:$0xff]   ;;  %v1404_v63 = vld [vmem:[%s1828_s10 + $0x10c] ss:$16 sps:$4 sm:$0xff]   ;;  %v1406_v0 = vld [vmem:[%s1828_s10 + $0x100] ss:$16 sps:$4 sm:$0xff]  }
  0x73   : > { %710 = vmatpush1.bf16.msra.mxu0 %v1346_v22  ;;  %751 = vmatpush1.bf16.msra.mxu1 %v1347_v23  ;;  %v1407_v1 = vld [vmem:[%s1828_s10 + $0x108] ss:$16 sps:$4 sm:$0xff]   ;;  %v1410_v3 = vld [vmem:[%s1881_s25 + $0x64] ss:$16 sps:$4 sm:$0xff]   ;;  %v1413_v4 = vld [vmem:[%s1881_s25 + $0x6c] ss:$16 sps:$4 sm:$0xff]  }
  0x74   : > { %711 = vmatprep.subr.bf16.mxu0 %v1348_v24  ;;  %752 = vmatprep.subr.bf16.mxu1 %v1350_v25  ;;  %v309_v2 = vld [vmem:[#allocation2] sm:$0xff]  ;;  %v1408_v6 = vld [vmem:[%s1881_s25 + $0x60] ss:$16 sps:$4 sm:$0xff]   ;;  %v1416_v8 = vld [vmem:[%s1881_s25 + $0x44] ss:$16 sps:$4 sm:$0xff]   ;;  %s1129_s14 = sshll.u32 %s1825_s0, 5 }
  0x75   : > { %v312_v5 = vpack.c.bf16 %v309_v2, %v309_v2  ;;  %v1411_v7 = vld [vmem:[%s1881_s25 + $0x68] ss:$16 sps:$4 sm:$0xff]   ;;  %v1419_v9 = vld [vmem:[%s1881_s25 + $0x4c] ss:$16 sps:$4 sm:$0xff]   ;;  %v1414_v10 = vld [vmem:[%s1881_s25 + $0x40] ss:$16 sps:$4 sm:$0xff]  }
  0x76   : > { %v1417_v11 = vld [vmem:[%s1881_s25 + $0x48] ss:$16 sps:$4 sm:$0xff]   ;;  %v1422_v12 = vld [vmem:[%s1881_s25 + $0x24] ss:$16 sps:$4 sm:$0xff]   ;;  %v1425_v13 = vld [vmem:[%s1881_s25 + $0x2c] ss:$16 sps:$4 sm:$0xff]  }
  0x77   : > { %712 = vmatpush1.bf16.msra.mxu0 %v1352_v26  ;;  %753 = vmatpush1.bf16.msra.mxu1 %v1353_v27  ;;  %v1420_v15 = vld [vmem:[%s1881_s25 + $0x20] ss:$16 sps:$4 sm:$0xff]   ;;  %v1423_v16 = vld [vmem:[%s1881_s25 + $0x28] ss:$16 sps:$4 sm:$0xff]   ;;  %v1428_v17 = vld [vmem:[%s1881_s25 + $0x4] ss:$16 sps:$4 sm:$0xff]  }
  0x78   : > { %713 = vmatprep.subr.bf16.mxu0 %v1354_v28  ;;  %754 = vmatprep.subr.bf16.mxu1 %v1356_v29  ;;  %v1431_v18 = vld [vmem:[%s1881_s25 + $0xc] ss:$16 sps:$4 sm:$0xff]   ;;  %v1426_v19 = vld [vmem:[%s1881_s25] ss:$16 sps:$4 sm:$0xff]   ;;  %v1429_v20 = vld [vmem:[%s1881_s25 + $0x8] ss:$16 sps:$4 sm:$0xff]  }
  0x79   : > { %v311_v21 = vld [vmem:[#allocation5] sm:$0xff]  ;;  %s1219_s29 = sshll.u32 %s1620_s18, 9  ;;  %s304_s12 = scalar_lea.vmem [#allocation9], %s1129_s14 }
  0x7a   : > { %v314_v22 = vpack.c.bf16 %v311_v21, %v311_v21  ;;  %s988_s30 = sshll.u32 %s304_s12, 4  ;;  %s1922_s6 = scalar_lea.hbm %s1974_s4, %s1219_s29  ;;  %s1924_s30 = int_to_ptr.vmem [resolvable:$true] %s988_s30 }
  0x7b   : > { %714 = vmatpush1.bf16.msra.mxu0 %v1358_v30  ;;  %755 = vmatpush1.bf16.msra.mxu1 %v1359_v31  ;;  %s972_s18 = scalar_lea.sflag [#allocation4], %s1825_s0  ;;  %s1540_s23 = scalar_lea.vmem %s1924_s30, 512 }
  0x7c   : > { %715 = vmatprep.subr.bf16.mxu0 %v1360_v32  ;;  %756 = vmatprep.subr.bf16.mxu1 %v1362_v33  ;;  %p1541_p3 = scmp.ne.s32.totalorder %s1924_s30, %s1540_s23  ;;  %p1993_p7 = scmp.ne.s32.totalorder %s1983_s26, 0 }
  0x7d   : > { %s1638_s22 = smov [#allocation9]  }
  0x7e   : > { %p1542_p13 = pnand %p1541_p3, %p1993_p7  ;;  %s1544_s24 = sshll.u32 %s1638_s22, 4  ;;  %s1545_s24 = int_to_ptr.vmem [resolvable:$false] %s1544_s24 }
  0x7f   : > { %716 = vmatpush2.bf16.msra.mxu0 %v1364_v34  ;;  %757 = vmatpush2.bf16.msra.mxu1 %v1365_v35  ;;  %s1546_s13 = scalar_lea.vmem %s1545_s24, 1024  ;;  %p1547_p9 = scmp.lt.s32.totalorder %s1924_s30, %s1545_s24 }
  0x80   : > { %717 = vmatprep.subr.bf16.mxu0 %v1366_v36  ;;  %758 = vmatprep.subr.bf16.mxu1 %v1368_v37  ;;  %p1543_p4 = pneg %p1542_p13  ;;  %p1548_p0 = scmp.lt.s32.totalorder %s1546_s13, %s1540_s23 }
  0x82   : > { %p1549_p8 = por %p1548_p0, %p1547_p9 }
  0x83   : > { %718 = vmatpush2.bf16.msra.mxu0 %v1370_v38  ;;  %759 = vmatpush2.bf16.msra.mxu1 %v1371_v39 }
  0x84   : > { %719 = vmatprep.subr.bf16.mxu0 %v1372_v40  ;;  %760 = vmatprep.subr.bf16.mxu1 %v1374_v41  ;;  %p1550_p10 = pnand %p1549_p8, %p1543_p4 }
  0x87   : > { %720 = vmatpush2.bf16.msra.mxu0 %v1376_v42  ;;  %761 = vmatpush2.bf16.msra.mxu1 %v1377_v43 }
  0x88   : > { %721 = vmatprep.subr.bf16.mxu0 %v1378_v44  ;;  %762 = vmatprep.subr.bf16.mxu1 %v1380_v45 }
  0x8b   : > { %722 = vmatpush2.bf16.msra.mxu0 %v1382_v48  ;;  %763 = vmatpush2.bf16.msra.mxu1 %v1383_v49 }
  0x8c   : > { %723 = vmatprep.subr.bf16.mxu0 %v1384_v50  ;;  %764 = vmatprep.subr.bf16.mxu1 %v1386_v51 }
  0x8f   : > { %724 = vmatpush2.bf16.msra.mxu0 %v1388_v52  ;;  %765 = vmatpush2.bf16.msra.mxu1 %v1389_v53 }
  0x90   : > { %725 = vmatprep.subr.bf16.mxu0 %v1390_v54  ;;  %766 = vmatprep.subr.bf16.mxu1 %v1392_v55 }
  0x93   : > { %726 = vmatpush2.bf16.msra.mxu0 %v1394_v56  ;;  %767 = vmatpush2.bf16.msra.mxu1 %v1395_v57 }
  0x94   : > { %727 = vmatprep.subr.bf16.mxu0 %v1396_v58  ;;  %768 = vmatprep.subr.bf16.mxu1 %v1398_v59 }
  0x97   : > { %728 = vmatpush2.bf16.msra.mxu0 %v1400_v60  ;;  %769 = vmatpush2.bf16.msra.mxu1 %v1401_v61 }
  0x98   : > { %729 = vmatprep.subr.bf16.mxu0 %v1402_v62  ;;  %770 = vmatprep.subr.bf16.mxu1 %v1404_v63 }
  0x9b   : > { %730 = vmatpush2.bf16.msra.mxu0 %v1406_v0  ;;  %771 = vmatpush2.bf16.msra.mxu1 %v1407_v1 }
  0x9c   : > { %889 = vmatprep.subr.bf16.mxu0 %v1410_v3  ;;  %930 = vmatprep.subr.bf16.mxu1 %v1413_v4 }
  0x9e   : > { %732 = vmatmul.mubr.bf16.vlgmr.msra.gmra.mxu0 %v312_v5  ;;  %773 = vmatmul.mubr.bf16.vlgmr.msra.gmra.mxu1 %v312_v5 }
  0x9f   : > { %890 = vmatpush1.bf16.msra.mxu0 %v1408_v6  ;;  %931 = vmatpush1.bf16.msra.mxu1 %v1411_v7 }
  0xa0   : > { %891 = vmatprep.subr.bf16.mxu0 %v1416_v8  ;;  %932 = vmatprep.subr.bf16.mxu1 %v1419_v9 }
  0xa1   : > { %913 = vmatprep.mubr.bf16.mxu0 %v1637_v14  ;;  %954 = vmatprep.mubr.bf16.mxu1 %v1637_v14 }
  0xa3   : > { %892 = vmatpush1.bf16.msra.mxu0 %v1414_v10  ;;  %933 = vmatpush1.bf16.msra.mxu1 %v1417_v11 }
  0xa4   : > { %893 = vmatprep.subr.bf16.mxu0 %v1422_v12  ;;  %934 = vmatprep.subr.bf16.mxu1 %v1425_v13 }
  0xa7   : > { %894 = vmatpush1.bf16.msra.mxu0 %v1420_v15  ;;  %935 = vmatpush1.bf16.msra.mxu1 %v1423_v16 }
  0xa8   : > { %895 = vmatprep.subr.bf16.mxu0 %v1428_v17  ;;  %936 = vmatprep.subr.bf16.mxu1 %v1431_v18 }
  0xab   : > { %896 = vmatpush1.bf16.msra.mxu0 %v1426_v19  ;;  %937 = vmatpush1.bf16.msra.mxu1 %v1429_v20 }
  0xae   : > { %1210 = vmatmul.mubr.msk.bf16.vlgmr.msra.gmra.mxu0 %vm877_vm0, %v314_v22  ;;  %1211 = vmatmul.mubr.msk.bf16.vlgmr.msra.gmra.mxu1 %vm877_vm0, %v314_v22 }
 0x15e   : > { %v733_v23 = vpop.f32.mrf.mxu0  ;;  %v774_v24 = vpop.f32.mrf.mxu1 }
 0x160   : > { %v735_v25 = vpop.f32.mrf.mxu0  ;;  %v776_v26 = vpop.f32.mrf.mxu1 }
 0x162   : > { %v737_v27 = vpop.f32.mrf.mxu0  ;;  %v778_v28 = vpop.f32.mrf.mxu1 }
 0x164   : > { %v738_v29 = vpop.f32.mrf.mxu0  ;;  %v779_v30 = vpop.f32.mrf.mxu1 }
 0x16e   : > { %v915_v31 = vpop.f32.mrf.mxu0  ;;  %v956_v32 = vpop.f32.mrf.mxu1 }
 0x16f   : > { %v963_v33 = vmul.f32 %v915_v31, %v733_v23  ;;  %v965_v34 = vmul.f32 %v956_v32, %v774_v24 }
 0x170   : > { %v917_v35 = vpop.f32.mrf.mxu0  ;;  %v958_v36 = vpop.f32.mrf.mxu1 }
 0x171   : > { %967 = vst [vmem:[%s304_s12] sm:$0xff] %v963_v33  ;;  %969 = vst [vmem:[%s304_s12 + $0x10] sm:$0xff] %v965_v34  ;;  %v964_v37 = vmul.f32 %v917_v35, %v735_v25  ;;  %v966_v38 = vmul.f32 %v958_v36, %v776_v26 }
 0x172   : > { %v919_v39 = vpop.f32.mrf.mxu0  ;;  %v960_v40 = vpop.f32.mrf.mxu1 }
 0x173   : > { %968 = vst [vmem:[%s304_s12 + $0x8] sm:$0xff] %v964_v37  ;;  %970 = vst [vmem:[%s304_s12 + $0x18] sm:$0xff] %v966_v38 }
 0x174   : > { %v920_v41 = vpop.f32.mrf.mxu0  ;;  %v961_v42 = vpop.f32.mrf.mxu1 }
 0x175   : > { %1553 = shalt.err (!%p1550_p10)
}
 0x176   : > { %s1554_s5 = scalar_lea.hbm %s1922_s6, 512  ;;  %s1558_s8 = scalar_lea.hbm %s1974_s4, 1024 }
 0x177   : > { %p1555_p12 = scmp.ne.s32.totalorder %s1922_s6, %s1554_s5  ;;  %p1559_p2 = scmp.lt.s32.totalorder %s1922_s6, %s1974_s4 }
 0x178   : > { %p1560_p5 = scmp.lt.s32.totalorder %s1558_s8, %s1554_s5 }
 0x179   : > { %p1556_p6 = pnand %p1555_p12, %p1993_p7 }
 0x17a   : > { %p1561_p1 = por %p1560_p5, %p1559_p2 }
 0x17b   : > { %p1557_p11 = pneg %p1556_p6 }
 0x17d   : > { %p1562_p3 = pnand %p1561_p1, %p1557_p11 }
 0x17f   : > { %1565 = shalt.err (!%p1562_p3)
}
 0x180   : > { %1232 = dma.vmem_to_hbm [thread:$0]  (%p1993_p7), %s1924_s30, 512, %s1922_s6, %s972_s18  }
 0x181 PF: > { %s1000_s25 = sand.u32 1, %s1608_s15   ;;  %p1994_p13 = scmp.ne.s32.totalorder %s1984_s27, 0 }
 0x182   : > { %p1995_p4 = scmp.ge.s32.totalorder %s1628_s20, 2  ;;  %s1001_s14 = scalar_lea.sflag [#allocation4], %s1000_s25 }
 0x184   : > { %p1249_p9 = pnand %p1995_p4, %p1994_p13 }
 0x186   : > { %p1250_p0 = pneg %p1249_p9 }
 0x188   : > { %1603 = dma.done.wait (%p1250_p0), %s1001_s14, 512  }
 0x189   : > { %1605 = vsyncadd (%p1250_p0), %s1001_s14, 4294966784  ;;  %s19_s20 = sadd.s32 1, %s1628_s20   ;;  %s1996_s26 = sld [smem:[#allocation14_spill]] }
 0x18a   : > { %p16_p8 = scmp.ge.s32.totalorder %s19_s20, 4   ;;  %s1997_s15 = smov %s1612_s16 }
 0x18b   : > { %s1998_s16 = smov %s1616_s17  ;;  %s1999_s17 = smov %s1769_s9 }
 0x18c   : > { %s2000_s18 = smov %s1624_s19  ;;  %18 = sbr.rel (!%p16_p8) target bundleno = 8 (0x8), region = 101 }
 0x18f   : > { %s2001_s19 = smov %s1996_s26 }
 0x191   :  { %1006 = vsyncpa [#allocation3], 1 }
 0x192   :  { %1008 = vsyncpa [#allocation3 + $0x1], 1 }
 0x193   :  { %1009 = vsyncpa [#allocation6], 1 }
 0x194   :  { %1010 = vsyncpa [#allocation4], 1 }
 0x195   :  { %1012 = vsyncpa [#allocation4 + $0x1], 1 }

</bundles_post_ra>
